<compile_context>
chip_gen: v6e
topology: v6e:2x2x1
jax: 0.10.0
libtpu: 0.0.40
codegen_flags: <defaults>
</compile_context>

<pallas_src>
import functools

import jax
import jax.numpy as jnp
from jax.experimental import pallas as pl
from jax.experimental.pallas import tpu as pltpu

EMB_DIM = 512             # fixed by the module: nn.Embedding(..., 512)
MAX_ROWS_ONEHOT = 256     # rows per grid step, one-hot path
MAX_ROWS_DMA = 512        # rows per grid step, DMA-gather path
NSEM = 16                 # row DMAs kept in flight in the gather path


def _round_up(x, m):
    return ((x + m - 1) // m) * m


def _vmem_capacity_bytes():
    try:
        return int(pltpu.get_tpu_info().vmem_capacity_bytes)
    except Exception:
        return 64 << 20   # conservative fallback (v7x per-TC VMEM)


# ---------------------------------------------------------------------------
# Path 1: resident table, one-hot MXU gather (small / moderate vocab)
# ---------------------------------------------------------------------------
def _onehot_gather_kernel(idx_ref, table_ref, out_ref):
    # idx_ref:   VMEM int32[(rows, 1)]   indices for this block (vector read)
    # table_ref: VMEM [(vpad, 512)]      whole padded table, resident (1-buf)
    # out_ref:   VMEM [(rows, 512)]      current output tile
    rows = out_ref.shape[0]
    vpad = table_ref.shape[0]
    idx = idx_ref[...]                                          # (rows, 1)
    iota = jax.lax.broadcasted_iota(jnp.int32, (rows, vpad), 1)
    # One-hot is built in the table's stored dtype (bf16 table -> bf16 MXU
    # operands on v5e/v6e/v7x; still an exact gather since entries are 0/1).
    onehot = (iota == idx).astype(table_ref.dtype)              # (rows, vpad)
    out_ref[...] = jnp.dot(
        onehot, table_ref[...], preferred_element_type=jnp.float32
    ).astype(out_ref.dtype)


# ---------------------------------------------------------------------------
# Path 2: table in HBM, per-row DMA gather straight into the output block
# ---------------------------------------------------------------------------
def _dma_gather_kernel(idx_ref, table_hbm, out_ref, sems):
    # idx_ref:   SMEM int32[(n_pad,)]     scalar-prefetched indices
    # table_hbm: HBM  [(vocab, 512)]      untiled (memory_space=pl.ANY)
    # out_ref:   VMEM [(rows, 512)]       current output tile (DMA destination)
    # sems:      DMA semaphores, shape (NSEM,)
    rows = out_ref.shape[0]
    vocab = table_hbm.shape[0]
    base = pl.program_id(0) * rows
    unroll = min(NSEM, rows)

    def row_copy(dst_row, src_row):
        # Every copy is exactly (1, EMB_DIM) of the table dtype, so waiting
        # with a src-row-0 descriptor is a valid stand-in for any row's copy.
        return pltpu.make_async_copy(
            table_hbm.at[pl.ds(src_row, 1), :],
            out_ref.at[pl.ds(dst_row, 1), :],
            sems.at[dst_row % NSEM],
        )

    def issue(r, carry):
        # Scalar index read + clip BEFORE any .wait(): DMA waits break SMEM
        # sst->sld forwarding, so keep the addressing pipeline ahead of them.
        src = jnp.clip(idx_ref[base + r], 0, vocab - 1)

        # Retire the copy that last used this semaphore slot -> at most NSEM
        # row copies in flight at any time.
        @pl.when(r >= NSEM)
        def _():
            row_copy(r - NSEM, 0).wait()

        row_copy(r, src).start()
        return carry

    jax.lax.fori_loop(0, rows, issue, 0, unroll=unroll)

    # Drain only the slots actually used (safe even if rows < NSEM).
    def drain(r, carry):
        row_copy(r, 0).wait()
        return carry

    jax.lax.fori_loop(max(0, rows - NSEM), rows, drain, 0, unroll=unroll)


# ---------------------------------------------------------------------------
# Wrapper
# ---------------------------------------------------------------------------
@functools.partial(jax.jit, static_argnames=("method",))
def records_embedding(x, table, method="auto"):
    """Pallas equivalent of RecordsEmbeding.forward: frozen table[x] lookup.

    Out-of-range indices are clamped into [0, vocab) (nn.Embedding would
    raise). Padded tail rows gather row 0 and are sliced off.  Passing the
    frozen table as bf16 halves HBM/VMEM bytes (recommended on v5e/v6e).
    """
    orig_shape = x.shape
    vocab, dim = table.shape
    assert dim == EMB_DIM

    idx = jnp.clip(x.reshape(-1).astype(jnp.int32), 0, vocab - 1)
    n = idx.shape[0]
    itemsize = jnp.dtype(table.dtype).itemsize
    cap = _vmem_capacity_bytes()

    if method == "auto":
        # Resident one-hot path only when the (single-buffered) padded table
        # is a small fraction of this generation's VMEM (128 MiB v5e/v6e,
        # 64 MiB v7x) and the one-hot matmul flops stay reasonable.
        table_bytes = _round_up(vocab, 256) * dim * itemsize
        method = "onehot" if (table_bytes <= cap // 8 and vocab <= 8192) else "dma"

    max_rows = MAX_ROWS_ONEHOT if method == "onehot" else MAX_ROWS_DMA
    # Aim for >= 2 row blocks when possible so v7x's two TensorCores both get
    # work under dimension_semantics=("parallel",); cap per-block rows to
    # amortize the ~0.35 us per-grid-step overhead without blowing VMEM.
    rows = max(8, min(max_rows, _round_up(max(n // 2, 1), 8)))
    n_pad = _round_up(n, rows)
    idx_p = jnp.pad(idx, (0, n_pad - n))          # pad with row 0 (discarded)
    grid = (n_pad // rows,)
    out_tile_bytes = rows * dim * itemsize

    if method == "onehot":
        vpad = _round_up(vocab, 256)              # 256-aligned MXU contraction
        table_p = table if vpad == vocab else jnp.pad(
            table, ((0, vpad - vocab), (0, 0)))
        table_bytes = vpad * dim * itemsize       # single-buffered (Buffered(1))
        onehot_bytes = rows * vpad * (4 + itemsize)   # iota/cmp + one-hot operand
        needed = (table_bytes + onehot_bytes + 2 * out_tile_bytes
                  + 2 * rows * 4 + (4 << 20))
        vmem_limit = int(min(max(needed, 32 << 20), cap * 3 // 4))
        out = pl.pallas_call(
            _onehot_gather_kernel,
            out_shape=jax.ShapeDtypeStruct((n_pad, dim), table.dtype),
            grid=grid,
            in_specs=[
                pl.BlockSpec((rows, 1), lambda i: (i, 0)),        # indices
                pl.BlockSpec((vpad, dim), lambda i: (0, 0),       # resident table
                             pipeline_mode=pl.Buffered(1)),
            ],
            out_specs=pl.BlockSpec((rows, dim), lambda i: (i, 0)),
            compiler_params=pltpu.CompilerParams(
                dimension_semantics=("parallel",),
                vmem_limit_bytes=vmem_limit,
            ),
        )(idx_p.reshape(n_pad, 1), table_p)

    elif method == "dma":
        needed = 2 * out_tile_bytes + (4 << 20)
        vmem_limit = int(min(max(needed, 32 << 20), cap * 3 // 4))
        # TODO(synk): for very large batches, swap the full-array scalar
        # prefetch for a per-block SMEM index BlockSpec so SMEM stays O(rows)
        # instead of next_pow2(4*n_pad) bytes.
        out = pl.pallas_call(
            _dma_gather_kernel,
            out_shape=jax.ShapeDtypeStruct((n_pad, dim), table.dtype),
            grid_spec=pltpu.PrefetchScalarGridSpec(
                num_scalar_prefetch=1,                      # idx_p -> SMEM
                grid=grid,
                in_specs=[pl.BlockSpec(memory_space=pl.ANY)],    # table in HBM
                out_specs=pl.BlockSpec((rows, dim), lambda i, idx_ref: (i, 0)),
                scratch_shapes=[pltpu.SemaphoreType.DMA((NSEM,))],
            ),
            compiler_params=pltpu.CompilerParams(
                dimension_semantics=("parallel",),
                vmem_limit_bytes=vmem_limit,
            ),
        )(idx_p, table)
    else:
        raise ValueError(f"unknown method: {method}")

    return out[:n].reshape(*orig_shape, dim)


def make_embedding_table(key, num_records, dtype=jnp.float32):
    """Deterministic stand-in for __init__ + embedding_weights:
    Embedding(num_records + 3, 512) whose last num_records rows are the
    (synthetic) record feature vectors; the table is frozen."""
    vocab = num_records + 3
    k_init, k_rcd = jax.random.split(key)
    weight = jax.random.normal(k_init, (vocab, EMB_DIM), dtype=jnp.float32)
    rcd2vec = jax.random.normal(k_rcd, (num_records, EMB_DIM), dtype=jnp.float32)
    # .weight.data[-num_records:].copy_(rcd2vec)
    weight = weight.at[-num_records:].set(rcd2vec)
    return weight.astype(dtype)


if __name__ == "__main__":
    key = jax.random.PRNGKey(0)
    k_tab, k_idx, k_idx2 = jax.random.split(key, 3)

    num_records = 32                 # synthetic small "records_4w" stand-in
    vocab = num_records + 3
    table = make_embedding_table(k_tab, num_records)

    # x: integer record ids, batch=2, seq=8
    x = jax.random.randint(k_idx, (2, 8), minval=0, maxval=vocab, dtype=jnp.int32)
    ref = jnp.take(table, x, axis=0)

    # Path 1: resident-table one-hot MXU gather (auto-dispatch for small vocab)
    out_auto = jax.block_until_ready(records_embedding(x, table))
    assert out_auto.shape == (2, 8, EMB_DIM), out_auto.shape
    assert out_auto.dtype == table.dtype
    assert jnp.allclose(out_auto, ref), "one-hot path mismatch vs reference"

    # Path 2: HBM DMA-gather (the path a realistic ~40k x 512 table takes)
    out_dma = jax.block_until_ready(records_embedding(x, table, method="dma"))
    assert jnp.allclose(out_dma, ref), "DMA-gather path mismatch vs reference"

    # Multi-block check (grid of >= 2) on both paths.
    x2 = jax.random.randint(k_idx2, (6, 50), minval=0, maxval=vocab,
                            dtype=jnp.int32)
    ref2 = jnp.take(table, x2, axis=0)
    out2a = jax.block_until_ready(records_embedding(x2, table, method="onehot"))
    out2b = jax.block_until_ready(records_embedding(x2, table, method="dma"))
    assert jnp.allclose(out2a, ref2), "one-hot multi-block mismatch"
    assert jnp.allclose(out2b, ref2), "DMA multi-block mismatch"

    # bf16 frozen table (recommended storage on v5e/v6e): gather is exact.
    table_bf = table.astype(jnp.bfloat16)
    ref_bf = jnp.take(table_bf, x, axis=0)
    out_bf = jax.block_until_ready(records_embedding(x, table_bf, method="onehot"))
    assert jnp.allclose(out_bf.astype(jnp.float32),
                        ref_bf.astype(jnp.float32)), "bf16 one-hot path mismatch"

    print("KERNEL_OK")
</pallas_src>

<mosaic_0001>
module attributes {stable_mosaic.version = 11 : i64} {
  func.func @_onehot_gather_kernel(%arg0: i32, %arg1: memref<8x1xi32, #tpu.memory_space<vmem>>, %arg2: memref<256x512xf32, #tpu.memory_space<vmem>>, %arg3: memref<8x512xf32, #tpu.memory_space<vmem>>) attributes {dimension_semantics = [#tpu.dimension_semantics<parallel>], iteration_bounds = array<i64: 2>, scalar_prefetch = 0 : i64, scratch_operands = 0 : i64, tpu.core_type = #tpu.core_type<tc>, window_params = [{transform_indices = @transform_0, window_bounds = array<i64: 8, 1>}, {pipeline_mode = #tpu.pipeline_mode<synchronous>, transform_indices = @transform_1, window_bounds = array<i64: 256, 512>}, {transform_indices = @transform_2, window_bounds = array<i64: 8, 512>}]} {
    %c0 = arith.constant 0 : index
    %c0_0 = arith.constant 0 : index
    %0 = vector.load %arg1[%c0, %c0_0] : memref<8x1xi32, #tpu.memory_space<vmem>>, vector<8x1xi32>
    %1 = tpu.iota {dimensions = array<i32: 1>} : vector<8x256xi32>
    %2 = vector.broadcast %0 : vector<8x1xi32> to vector<8x256xi32>
    %3 = arith.cmpi eq, %1, %2 : vector<8x256xi32>
    %4 = arith.extui %3 : vector<8x256xi1> to vector<8x256xi32>
    %5 = arith.sitofp %4 : vector<8x256xi32> to vector<8x256xf32>
    %c0_1 = arith.constant 0 : index
    %c0_2 = arith.constant 0 : index
    %6 = vector.load %arg2[%c0_1, %c0_2] : memref<256x512xf32, #tpu.memory_space<vmem>>, vector<256x512xf32>
    %cst = arith.constant dense<0.000000e+00> : vector<8x512xf32>
    %7 = tpu.matmul %5, %6, %cst {dimension_numbers = #tpu.dot_dimension_numbers<[1], [0], [0], [1], [0, 0, 1, 1], [], []>} : vector<8x256xf32>, vector<256x512xf32>, vector<8x512xf32> -> vector<8x512xf32>
    %c0_3 = arith.constant 0 : index
    %c0_4 = arith.constant 0 : index
    %8 = vector.load %arg3[%c0_3, %c0_4] : memref<8x512xf32, #tpu.memory_space<vmem>>, vector<8x512xf32>
    tpu.vector_store %arg3[%c0_3, %c0_4], %7 {strides = array<i32>} : memref<8x512xf32, #tpu.memory_space<vmem>>, vector<8x512xf32>,
    return
  }
  func.func @transform_0(%arg0: i32) -> (i32, i32) {
    %c0_i32 = arith.constant 0 : i32
    %c0_i32_0 = arith.constant 0 : i32
    return %arg0, %c0_i32 : i32, i32
  }
  func.func @transform_1(%arg0: i32) -> (i32, i32) {
    %c0_i32 = arith.constant 0 : i32
    %c0_i32_0 = arith.constant 0 : i32
    %c0_i32_1 = arith.constant 0 : i32
    return %c0_i32, %c0_i32_0 : i32, i32
  }
  func.func @transform_2(%arg0: i32) -> (i32, i32) {
    %c0_i32 = arith.constant 0 : i32
    %c0_i32_0 = arith.constant 0 : i32
    return %arg0, %c0_i32 : i32, i32
  }
}

</mosaic_0001>

<bundles_post_ra>
// kernel: records_embedding.1
= control target key start
LH: loop header
LB: loop body
LE: loop exit
PB: predicated region body
PF: predicated region fallthrough
CT: control target
= control target key end

     0   :  { %7 = vsyncpa [#allocation3], 0  ;;  %s1123_s0 = inlined_call_operand.vmem [shape: s32[16,1], index: 0, kind: input, shape index: {}]   ;;  %s1124_s1 = inlined_call_operand.vmem [shape: f32[256,512], index: 1, kind: input, shape index: {}]   ;;  %s1125_s2 = inlined_call_operand.hbm [shape: f32[16,512], index: 2, kind: output, shape index: {}]  }
   0x1   :  { %9 = vsyncpa [#allocation3 + $0x1], 0  ;;  %s640_s9 = smov 0   ;;  %s642_s10 = smov 0  }
   0x2   :  { %s644_s11 = smov 0   ;;  %s646_s12 = smov 0  }
   0x3 LB: > { %s661_s13 = sadd.s32 4294967295, %s620_s12   ;;  %s500_s14 = sadd.s32 4294967294, %s620_s12   ;;  %s620_s12 = sphi %s646_s12, %s1131_s12   ;;  %s616_s11 = sphi %s644_s11, %s1130_s11   ;;  %s612_s10 = sphi %s642_s10, %s1129_s10   ;;  %s608_s9 = sphi %s640_s9, %s1128_s9  }
   0x4   : > { %s665_s15 = sadd.s32 1, %s620_s12   ;;  %s69_s16 = sadd.s32 1, %s616_s11 }
   0x5   : > { %s66_s17 = ssub.s32 %s620_s12, %s665_s15  ;;  %p79_p0 = scmp.ne.s32.totalorder %s616_s11, %s612_s10 }
   0x6   : > { %p67_p1 = scmp.eq.s32.totalorder %s66_s17, 0  ;;  %p80_p2 = scmp.eq.s32.totalorder %s661_s13, 1 }
   0x7   : > { %p85_p3 = scmp.ne.s32.totalorder %s612_s10, %s608_s9  ;;  %p86_p4 = scmp.eq.s32.totalorder %s500_s14, 1 }
   0x8   : > { %s676_s18 = scalar_select %p67_p1, %s616_s11, %s69_s16  }
   0x9   : > { %p678_p5 = por %p80_p2, %p79_p0  ;;  %p682_p6 = por %p86_p4, %p85_p3 }
   0xa   : > { %p503_p7 = scmp.ge.s32.totalorder %s620_s12, 1  ;;  %p114_p8 = scmp.lt.s32.totalorder %s620_s12, 3 }
   0xc   : > { %p115_p9 = pnand %p503_p7, %p114_p8 }
   0xd   : > { %p135_p10 = scmp.lt.s32.totalorder (!%p115_p9), %s661_s13, 1  ;;  %s517_s14 = sshll.u32 (!%p115_p9), %s661_s13, 9 }
   0xe   : > { %118 = sbr.rel (%p115_p9) target bundleno = 360 (0x168), region = 28  ;;  %s1082_s23 = scalar_lea.hbm (!%p115_p9), %s1125_s2, %s517_s14 }
  0x13   : > { %v213_v0 = vld [vmem:[%s1124_s1 + $0x1e8] sm:$0xff]  ;;  %v215_v1 = vld [vmem:[%s1124_s1 + $0x1f8] sm:$0xff]  ;;  %v212_v2 = vld [vmem:[%s1124_s1 + $0x1e0] sm:$0xff]  ;;  %v622_v3 = vmov 0   ;;  %s136_s5 = scalar_select %p135_p10, %s661_s13, 1 }
  0x14   : > { %559 = vset.pattern.permute.xlu0 %v622_v3  ;;  %280 = vmatprep.subr.mxu0 %v213_v0  ;;  %v214_v4 = vld [vmem:[%s1124_s1 + $0x1f0] sm:$0xff]  ;;  %v209_v5 = vld [vmem:[%s1124_s1 + $0x1c8] sm:$0xff]  ;;  %v211_v6 = vld [vmem:[%s1124_s1 + $0x1d8] sm:$0xff] }
  0x15   : > { %351 = vmatprep.subr.mxu1 %v215_v1  ;;  %281 = vmatpush1.msra.mxu0 %v212_v2  ;;  %v208_v7 = vld [vmem:[%s1124_s1 + $0x1c0] sm:$0xff]  ;;  %v210_v8 = vld [vmem:[%s1124_s1 + $0x1d0] sm:$0xff]  ;;  %v205_v9 = vld [vmem:[%s1124_s1 + $0x1a8] sm:$0xff]  ;;  %s505_s25 = sshll.u32 %s136_s5, 3  ;;  %s132_s5 = sand.u32 1, %s612_s10  }
  0x16   : > { %352 = vmatpush1.msra.mxu1 %v214_v4  ;;  %282 = vmatprep.subr.mxu0 %v209_v5  ;;  %v207_v10 = vld [vmem:[%s1124_s1 + $0x1b8] sm:$0xff]  ;;  %v204_v11 = vld [vmem:[%s1124_s1 + $0x1a0] sm:$0xff]  ;;  %v206_v12 = vld [vmem:[%s1124_s1 + $0x1b0] sm:$0xff]  ;;  %s138_s30 = scalar_lea.vmem %s1123_s0, %s505_s25  ;;  %s504_s8 = sshll.u32 %s132_s5, 5 }
  0x17   : > { %353 = vmatprep.subr.mxu1 %v211_v6  ;;  %283 = vmatpush1.msra.mxu0 %v208_v7  ;;  %v201_v13 = vld [vmem:[%s1124_s1 + $0x188] sm:$0xff]  ;;  %v203_v14 = vld [vmem:[%s1124_s1 + $0x198] sm:$0xff]  ;;  %v139_v15 = vld [vmem:[%s138_s30] sm:$0xff]  ;;  %s134_s16 = scalar_lea.vmem [#allocation2], %s504_s8  ;;  %s427_s13 = scalar_lea.sflag [#allocation3], %s132_s5 }
  0x18   : > { %354 = vmatpush1.msra.mxu1 %v210_v8  ;;  %284 = vmatprep.subr.mxu0 %v205_v9  ;;  %v200_v16 = vld [vmem:[%s1124_s1 + $0x180] sm:$0xff]  ;;  %v202_v17 = vld [vmem:[%s1124_s1 + $0x190] sm:$0xff]  ;;  %v197_v18 = vld [vmem:[%s1124_s1 + $0x168] sm:$0xff]  ;;  %s441_s17 = sshll.u32 %s134_s16, 4  ;;  %s624_s25 = smov [#allocation2]   ;;  %s1084_s17 = int_to_ptr.vmem [resolvable:$true] %s441_s17 }
  0x19   : > { %355 = vmatprep.subr.mxu1 %v207_v10  ;;  %285 = vmatpush1.msra.mxu0 %v204_v11  ;;  %v199_v19 = vld [vmem:[%s1124_s1 + $0x178] sm:$0xff]  ;;  %v196_v20 = vld [vmem:[%s1124_s1 + $0x160] sm:$0xff]  ;;  %v198_v21 = vld [vmem:[%s1124_s1 + $0x170] sm:$0xff]  ;;  %s560_s24 = scalar_lea.vmem %s1084_s17, 512  ;;  %s564_s26 = sshll.u32 %s624_s25, 4  ;;  %s565_s26 = int_to_ptr.vmem [resolvable:$false] %s564_s26 }
  0x1a   : > { %144 = vperm.xlu0 %559, %v139_v15   ;;  %356 = vmatpush1.msra.mxu1 %v206_v12  ;;  %v193_v22 = vld [vmem:[%s1124_s1 + $0x148] sm:$0xff]  ;;  %v195_v23 = vld [vmem:[%s1124_s1 + $0x158] sm:$0xff]  ;;  %v192_v24 = vld [vmem:[%s1124_s1 + $0x140] sm:$0xff]  ;;  %p561_p11 = scmp.ne.s32.totalorder %s1084_s17, %s560_s24  ;;  %s566_s27 = scalar_lea.vmem %s565_s26, 1024 }
  0x1b   : > { %286 = vmatprep.subr.mxu0 %v201_v13  ;;  %357 = vmatprep.subr.mxu1 %v203_v14  ;;  %v194_v25 = vld [vmem:[%s1124_s1 + $0x150] sm:$0xff]  ;;  %v189_v26 = vld [vmem:[%s1124_s1 + $0x128] sm:$0xff]  ;;  %v191_v27 = vld [vmem:[%s1124_s1 + $0x138] sm:$0xff]  ;;  %p567_p0 = scmp.lt.s32.totalorder %s1084_s17, %s565_s26  ;;  %p568_p1 = scmp.lt.s32.totalorder %s566_s27, %s560_s24 }
  0x1c   : > { %287 = vmatpush1.msra.mxu0 %v200_v16  ;;  %358 = vmatpush1.msra.mxu1 %v202_v17  ;;  %v188_v28 = vld [vmem:[%s1124_s1 + $0x120] sm:$0xff]  ;;  %v190_v29 = vld [vmem:[%s1124_s1 + $0x130] sm:$0xff]  ;;  %v185_v30 = vld [vmem:[%s1124_s1 + $0x108] sm:$0xff]  ;;  %p562_p12 = pnand %p561_p11, %p678_p5 }
  0x1d   : > { %288 = vmatprep.subr.mxu0 %v197_v18  ;;  %359 = vmatprep.subr.mxu1 %v199_v19  ;;  %v187_v31 = vld [vmem:[%s1124_s1 + $0x118] sm:$0xff]  ;;  %v184_v32 = vld [vmem:[%s1124_s1 + $0x100] sm:$0xff]  ;;  %v186_v33 = vld [vmem:[%s1124_s1 + $0x110] sm:$0xff]  ;;  %p569_p2 = por %p568_p1, %p567_p0 }
  0x1e   : > { %289 = vmatpush1.msra.mxu0 %v196_v20  ;;  %360 = vmatpush1.msra.mxu1 %v198_v21  ;;  %v181_v34 = vld [vmem:[%s1124_s1 + $0xe8] sm:$0xff]  ;;  %v183_v35 = vld [vmem:[%s1124_s1 + $0xf8] sm:$0xff]  ;;  %v180_v36 = vld [vmem:[%s1124_s1 + $0xe0] sm:$0xff]  ;;  %p563_p13 = pneg %p562_p12 }
  0x1f   : > { %290 = vmatprep.subr.mxu0 %v193_v22  ;;  %361 = vmatprep.subr.mxu1 %v195_v23  ;;  %v182_v37 = vld [vmem:[%s1124_s1 + $0xf0] sm:$0xff]  ;;  %v177_v38 = vld [vmem:[%s1124_s1 + $0xc8] sm:$0xff]  ;;  %v179_v39 = vld [vmem:[%s1124_s1 + $0xd8] sm:$0xff] }
  0x20   : > { %291 = vmatpush1.msra.mxu0 %v192_v24  ;;  %362 = vmatpush1.msra.mxu1 %v194_v25  ;;  %v176_v40 = vld [vmem:[%s1124_s1 + $0xc0] sm:$0xff]  ;;  %v178_v41 = vld [vmem:[%s1124_s1 + $0xd0] sm:$0xff]  ;;  %v173_v42 = vld [vmem:[%s1124_s1 + $0xa8] sm:$0xff]  ;;  %p570_p3 = pnand %p569_p2, %p563_p13 }
  0x21   : > { %292 = vmatprep.subr.mxu0 %v189_v26  ;;  %363 = vmatprep.subr.mxu1 %v191_v27  ;;  %v175_v43 = vld [vmem:[%s1124_s1 + $0xb8] sm:$0xff]  ;;  %v172_v44 = vld [vmem:[%s1124_s1 + $0xa0] sm:$0xff]  ;;  %v174_v45 = vld [vmem:[%s1124_s1 + $0xb0] sm:$0xff] }
  0x22   : > { %293 = vmatpush1.msra.mxu0 %v188_v28  ;;  %364 = vmatpush1.msra.mxu1 %v190_v29  ;;  %v169_v46 = vld [vmem:[%s1124_s1 + $0x88] sm:$0xff]  ;;  %v171_v47 = vld [vmem:[%s1124_s1 + $0x98] sm:$0xff]  ;;  %v168_v48 = vld [vmem:[%s1124_s1 + $0x80] sm:$0xff] }
  0x23   : > { %294 = vmatprep.subr.mxu0 %v185_v30  ;;  %365 = vmatprep.subr.mxu1 %v187_v31  ;;  %v170_v49 = vld [vmem:[%s1124_s1 + $0x90] sm:$0xff]  ;;  %v165_v50 = vld [vmem:[%s1124_s1 + $0x68] sm:$0xff]  ;;  %v167_v51 = vld [vmem:[%s1124_s1 + $0x78] sm:$0xff] }
  0x24   : > { %295 = vmatpush1.msra.mxu0 %v184_v32  ;;  %366 = vmatpush1.msra.mxu1 %v186_v33  ;;  %v164_v52 = vld [vmem:[%s1124_s1 + $0x60] sm:$0xff]  ;;  %v166_v53 = vld [vmem:[%s1124_s1 + $0x70] sm:$0xff]  ;;  %v161_v54 = vld [vmem:[%s1124_s1 + $0x48] sm:$0xff] }
  0x25   : > { %296 = vmatprep.subr.mxu0 %v181_v34  ;;  %367 = vmatprep.subr.mxu1 %v183_v35  ;;  %v163_v55 = vld [vmem:[%s1124_s1 + $0x58] sm:$0xff]  ;;  %v160_v56 = vld [vmem:[%s1124_s1 + $0x40] sm:$0xff]  ;;  %v162_v57 = vld [vmem:[%s1124_s1 + $0x50] sm:$0xff] }
  0x26   : > { %297 = vmatpush1.msra.mxu0 %v180_v36  ;;  %368 = vmatpush1.msra.mxu1 %v182_v37  ;;  %v157_v58 = vld [vmem:[%s1124_s1 + $0x28] sm:$0xff]  ;;  %v159_v59 = vld [vmem:[%s1124_s1 + $0x38] sm:$0xff]  ;;  %v156_v60 = vld [vmem:[%s1124_s1 + $0x20] sm:$0xff] }
  0x27   : > { %298 = vmatprep.subr.mxu0 %v177_v38  ;;  %369 = vmatprep.subr.mxu1 %v179_v39  ;;  %v158_v61 = vld [vmem:[%s1124_s1 + $0x30] sm:$0xff]  ;;  %v153_v62 = vld [vmem:[%s1124_s1 + $0x8] sm:$0xff]  ;;  %v155_v63 = vld [vmem:[%s1124_s1 + $0x18] sm:$0xff] }
  0x28   : > { %299 = vmatpush1.msra.mxu0 %v176_v40  ;;  %370 = vmatpush1.msra.mxu1 %v178_v41  ;;  %v152_v0 = vld [vmem:[%s1124_s1] sm:$0xff]  ;;  %v154_v1 = vld [vmem:[%s1124_s1 + $0x10] sm:$0xff]  ;;  %v277_v2 = vld [vmem:[%s1124_s1 + $0x3e8] sm:$0xff] }
  0x29   : > { %300 = vmatprep.subr.mxu0 %v173_v42  ;;  %371 = vmatprep.subr.mxu1 %v175_v43  ;;  %v279_v3 = vld [vmem:[%s1124_s1 + $0x3f8] sm:$0xff]  ;;  %v276_v4 = vld [vmem:[%s1124_s1 + $0x3e0] sm:$0xff]  ;;  %v278_v5 = vld [vmem:[%s1124_s1 + $0x3f0] sm:$0xff] }
  0x2a   : > { %301 = vmatpush1.msra.mxu0 %v172_v44  ;;  %372 = vmatpush1.msra.mxu1 %v174_v45  ;;  %v273_v6 = vld [vmem:[%s1124_s1 + $0x3c8] sm:$0xff]  ;;  %v275_v7 = vld [vmem:[%s1124_s1 + $0x3d8] sm:$0xff]  ;;  %v272_v8 = vld [vmem:[%s1124_s1 + $0x3c0] sm:$0xff] }
  0x2b   : > { %302 = vmatprep.subr.mxu0 %v169_v46  ;;  %373 = vmatprep.subr.mxu1 %v171_v47  ;;  %v274_v9 = vld [vmem:[%s1124_s1 + $0x3d0] sm:$0xff]  ;;  %v269_v10 = vld [vmem:[%s1124_s1 + $0x3a8] sm:$0xff]  ;;  %v271_v11 = vld [vmem:[%s1124_s1 + $0x3b8] sm:$0xff] }
  0x2c   : > { %303 = vmatpush1.msra.mxu0 %v168_v48  ;;  %374 = vmatpush1.msra.mxu1 %v170_v49  ;;  %v268_v12 = vld [vmem:[%s1124_s1 + $0x3a0] sm:$0xff]  ;;  %v270_v13 = vld [vmem:[%s1124_s1 + $0x3b0] sm:$0xff]  ;;  %v265_v14 = vld [vmem:[%s1124_s1 + $0x388] sm:$0xff] }
  0x2d   : > { %304 = vmatprep.subr.mxu0 %v165_v50  ;;  %375 = vmatprep.subr.mxu1 %v167_v51  ;;  %v267_v15 = vld [vmem:[%s1124_s1 + $0x398] sm:$0xff]  ;;  %v264_v16 = vld [vmem:[%s1124_s1 + $0x380] sm:$0xff]  ;;  %v266_v17 = vld [vmem:[%s1124_s1 + $0x390] sm:$0xff] }
  0x2e   : > { %305 = vmatpush1.msra.mxu0 %v164_v52  ;;  %376 = vmatpush1.msra.mxu1 %v166_v53  ;;  %v261_v18 = vld [vmem:[%s1124_s1 + $0x368] sm:$0xff]  ;;  %v263_v19 = vld [vmem:[%s1124_s1 + $0x378] sm:$0xff]  ;;  %v260_v20 = vld [vmem:[%s1124_s1 + $0x360] sm:$0xff] }
  0x2f   : > { %306 = vmatprep.subr.mxu0 %v161_v54  ;;  %377 = vmatprep.subr.mxu1 %v163_v55  ;;  %v262_v21 = vld [vmem:[%s1124_s1 + $0x370] sm:$0xff]  ;;  %v257_v22 = vld [vmem:[%s1124_s1 + $0x348] sm:$0xff]  ;;  %v259_v23 = vld [vmem:[%s1124_s1 + $0x358] sm:$0xff] }
  0x30   : > { %307 = vmatpush1.msra.mxu0 %v160_v56  ;;  %378 = vmatpush1.msra.mxu1 %v162_v57  ;;  %v256_v24 = vld [vmem:[%s1124_s1 + $0x340] sm:$0xff]  ;;  %v258_v25 = vld [vmem:[%s1124_s1 + $0x350] sm:$0xff]  ;;  %v253_v26 = vld [vmem:[%s1124_s1 + $0x328] sm:$0xff] }
  0x31   : > { %308 = vmatprep.subr.mxu0 %v157_v58  ;;  %379 = vmatprep.subr.mxu1 %v159_v59  ;;  %v255_v27 = vld [vmem:[%s1124_s1 + $0x338] sm:$0xff]  ;;  %v252_v28 = vld [vmem:[%s1124_s1 + $0x320] sm:$0xff]  ;;  %v254_v29 = vld [vmem:[%s1124_s1 + $0x330] sm:$0xff] }
  0x32   : > { %309 = vmatpush1.msra.mxu0 %v156_v60  ;;  %380 = vmatpush1.msra.mxu1 %v158_v61  ;;  %v249_v30 = vld [vmem:[%s1124_s1 + $0x308] sm:$0xff]  ;;  %v251_v31 = vld [vmem:[%s1124_s1 + $0x318] sm:$0xff]  ;;  %v248_v32 = vld [vmem:[%s1124_s1 + $0x300] sm:$0xff] }
  0x33   : > { %310 = vmatprep.subr.mxu0 %v153_v62  ;;  %381 = vmatprep.subr.mxu1 %v155_v63  ;;  %v250_v33 = vld [vmem:[%s1124_s1 + $0x310] sm:$0xff]  ;;  %v245_v34 = vld [vmem:[%s1124_s1 + $0x2e8] sm:$0xff]  ;;  %v247_v35 = vld [vmem:[%s1124_s1 + $0x2f8] sm:$0xff] }
  0x34   : > { %311 = vmatpush1.msra.mxu0 %v152_v0  ;;  %382 = vmatpush1.msra.mxu1 %v154_v1  ;;  %v244_v36 = vld [vmem:[%s1124_s1 + $0x2e0] sm:$0xff]  ;;  %v246_v37 = vld [vmem:[%s1124_s1 + $0x2f0] sm:$0xff]  ;;  %v241_v38 = vld [vmem:[%s1124_s1 + $0x2c8] sm:$0xff] }
  0x35   : > { %312 = vmatprep.subr.mxu0 %v277_v2  ;;  %383 = vmatprep.subr.mxu1 %v279_v3  ;;  %v243_v39 = vld [vmem:[%s1124_s1 + $0x2d8] sm:$0xff]  ;;  %v240_v40 = vld [vmem:[%s1124_s1 + $0x2c0] sm:$0xff]  ;;  %v242_v41 = vld [vmem:[%s1124_s1 + $0x2d0] sm:$0xff]  ;;  %v140_v2 = vlaneseq }
  0x36   : > { %313 = vmatpush2.msra.mxu0 %v276_v4  ;;  %384 = vmatpush2.msra.mxu1 %v278_v5  ;;  %v237_v42 = vld [vmem:[%s1124_s1 + $0x2a8] sm:$0xff]  ;;  %v239_v43 = vld [vmem:[%s1124_s1 + $0x2b8] sm:$0xff]  ;;  %v236_v44 = vld [vmem:[%s1124_s1 + $0x2a0] sm:$0xff] }
  0x37   : > { %314 = vmatprep.subr.mxu0 %v273_v6  ;;  %385 = vmatprep.subr.mxu1 %v275_v7  ;;  %v238_v45 = vld [vmem:[%s1124_s1 + $0x2b0] sm:$0xff]  ;;  %v233_v46 = vld [vmem:[%s1124_s1 + $0x288] sm:$0xff]  ;;  %v235_v47 = vld [vmem:[%s1124_s1 + $0x298] sm:$0xff]  ;;  %v141_v3 = vand.u32 127, %v140_v2  ;;  %v623_v6 = vmov 1.0  }
  0x38   : > { %315 = vmatpush2.msra.mxu0 %v272_v8  ;;  %386 = vmatpush2.msra.mxu1 %v274_v9  ;;  %v232_v48 = vld [vmem:[%s1124_s1 + $0x280] sm:$0xff]  ;;  %v234_v49 = vld [vmem:[%s1124_s1 + $0x290] sm:$0xff]  ;;  %v229_v50 = vld [vmem:[%s1124_s1 + $0x268] sm:$0xff] }
  0x39   : > { %316 = vmatprep.subr.mxu0 %v269_v10  ;;  %387 = vmatprep.subr.mxu1 %v271_v11  ;;  %v231_v51 = vld [vmem:[%s1124_s1 + $0x278] sm:$0xff]  ;;  %v228_v52 = vld [vmem:[%s1124_s1 + $0x260] sm:$0xff]  ;;  %v230_v53 = vld [vmem:[%s1124_s1 + $0x270] sm:$0xff]  ;;  %v142_v4 = vadd.s32 128, %v141_v3 }
  0x3a   : > { %317 = vmatpush2.msra.mxu0 %v268_v12  ;;  %388 = vmatpush2.msra.mxu1 %v270_v13  ;;  %v225_v54 = vld [vmem:[%s1124_s1 + $0x248] sm:$0xff]  ;;  %v227_v55 = vld [vmem:[%s1124_s1 + $0x258] sm:$0xff]  ;;  %v224_v56 = vld [vmem:[%s1124_s1 + $0x240] sm:$0xff] }
  0x3b   : > { %318 = vmatprep.subr.mxu0 %v265_v14  ;;  %389 = vmatprep.subr.mxu1 %v267_v15  ;;  %v226_v57 = vld [vmem:[%s1124_s1 + $0x250] sm:$0xff]  ;;  %v221_v58 = vld [vmem:[%s1124_s1 + $0x228] sm:$0xff]  ;;  %v223_v59 = vld [vmem:[%s1124_s1 + $0x238] sm:$0xff] }
  0x3c   : > { %319 = vmatpush2.msra.mxu0 %v264_v16  ;;  %390 = vmatpush2.msra.mxu1 %v266_v17  ;;  %v220_v60 = vld [vmem:[%s1124_s1 + $0x220] sm:$0xff]  ;;  %v222_v61 = vld [vmem:[%s1124_s1 + $0x230] sm:$0xff]  ;;  %v217_v62 = vld [vmem:[%s1124_s1 + $0x208] sm:$0xff] }
  0x3d   : > { %320 = vmatprep.subr.mxu0 %v261_v18  ;;  %391 = vmatprep.subr.mxu1 %v263_v19  ;;  %v219_v63 = vld [vmem:[%s1124_s1 + $0x218] sm:$0xff]  ;;  %v216_v0 = vld [vmem:[%s1124_s1 + $0x200] sm:$0xff]  ;;  %v218_v1 = vld [vmem:[%s1124_s1 + $0x210] sm:$0xff] }
  0x3e   : > { %321 = vmatpush2.msra.mxu0 %v260_v20  ;;  %392 = vmatpush2.msra.mxu1 %v262_v21 }
  0x3f   : > { %322 = vmatprep.subr.mxu0 %v257_v22  ;;  %393 = vmatprep.subr.mxu1 %v259_v23 }
  0x40   : > { %323 = vmatpush2.msra.mxu0 %v256_v24  ;;  %394 = vmatpush2.msra.mxu1 %v258_v25 }
  0x41   : > { %324 = vmatprep.subr.mxu0 %v253_v26  ;;  %395 = vmatprep.subr.mxu1 %v255_v27 }
  0x42   : > { %325 = vmatpush2.msra.mxu0 %v252_v28  ;;  %396 = vmatpush2.msra.mxu1 %v254_v29 }
  0x43   : > { %326 = vmatprep.subr.mxu0 %v249_v30  ;;  %397 = vmatprep.subr.mxu1 %v251_v31 }
  0x44   : > { %327 = vmatpush2.msra.mxu0 %v248_v32  ;;  %398 = vmatpush2.msra.mxu1 %v250_v33 }
  0x45   : > { %328 = vmatprep.subr.mxu0 %v245_v34  ;;  %399 = vmatprep.subr.mxu1 %v247_v35 }
  0x46   : > { %329 = vmatpush2.msra.mxu0 %v244_v36  ;;  %400 = vmatpush2.msra.mxu1 %v246_v37 }
  0x47   : > { %330 = vmatprep.subr.mxu0 %v241_v38  ;;  %401 = vmatprep.subr.mxu1 %v243_v39 }
  0x48   : > { %331 = vmatpush2.msra.mxu0 %v240_v40  ;;  %402 = vmatpush2.msra.mxu1 %v242_v41 }
  0x49   : > { %332 = vmatprep.subr.mxu0 %v237_v42  ;;  %403 = vmatprep.subr.mxu1 %v239_v43 }
  0x4a   : > { %333 = vmatpush2.msra.mxu0 %v236_v44  ;;  %404 = vmatpush2.msra.mxu1 %v238_v45 }
  0x4b   : > { %334 = vmatprep.subr.mxu0 %v233_v46  ;;  %405 = vmatprep.subr.mxu1 %v235_v47 }
  0x4c   : > { %335 = vmatpush2.msra.mxu0 %v232_v48  ;;  %406 = vmatpush2.msra.mxu1 %v234_v49 }
  0x4d   : > { %336 = vmatprep.subr.mxu0 %v229_v50  ;;  %407 = vmatprep.subr.mxu1 %v231_v51 }
  0x4e   : > { %337 = vmatpush2.msra.mxu0 %v228_v52  ;;  %408 = vmatpush2.msra.mxu1 %v230_v53 }
  0x4f   : > { %338 = vmatprep.subr.mxu0 %v225_v54  ;;  %409 = vmatprep.subr.mxu1 %v227_v55 }
  0x50   : > { %339 = vmatpush2.msra.mxu0 %v224_v56  ;;  %410 = vmatpush2.msra.mxu1 %v226_v57 }
  0x51   : > { %340 = vmatprep.subr.mxu0 %v221_v58  ;;  %411 = vmatprep.subr.mxu1 %v223_v59 }
  0x52   : > { %341 = vmatpush2.msra.mxu0 %v220_v60  ;;  %412 = vmatpush2.msra.mxu1 %v222_v61 }
  0x53   : > { %342 = vmatprep.subr.mxu0 %v217_v62  ;;  %413 = vmatprep.subr.mxu1 %v219_v63 }
  0x54   : > { %343 = vmatpush2.msra.mxu0 %v216_v0  ;;  %414 = vmatpush2.msra.mxu1 %v218_v1 }
  0x95   : > { %v145_v5 = vpop.permute.xlu0 %144 }
  0x96   : > { %vm146_vm0 = vcmp.eq.s32.totalorder %v141_v3, %v145_v5  ;;  %vm147_vm1 = vcmp.eq.s32.totalorder %v142_v4, %v145_v5 }
  0x97   : > { %508 = vmatprep.mubr.msk.f32.mxu0 %vm147_vm1, %v623_v6  ;;  %510 = vmatprep.mubr.msk.f32.mxu1 %vm147_vm1, %v623_v6 }
  0x98   : > { %509 = vmatmul.mubr.msk.f32.vlgmr.msra.gmra.mxu0 %vm146_vm0, %v623_v6  ;;  %511 = vmatmul.mubr.msk.f32.vlgmr.msra.gmra.mxu1 %vm146_vm0, %v623_v6 }
 0x158   : > { %v346_v7 = vpop.f32.mrf.mxu0  ;;  %v417_v8 = vpop.f32.mrf.mxu1 }
 0x159   : > { %422 = vst [vmem:[%s134_s16] sm:$0xff] %v346_v7  ;;  %424 = vst [vmem:[%s134_s16 + $0x10] sm:$0xff] %v417_v8 }
 0x15a   : > { %v348_v9 = vpop.f32.mrf.mxu0  ;;  %v419_v10 = vpop.f32.mrf.mxu1 }
 0x15b   : > { %423 = vst [vmem:[%s134_s16 + $0x8] sm:$0xff] %v348_v9  ;;  %425 = vst [vmem:[%s134_s16 + $0x18] sm:$0xff] %v419_v10 }
 0x15c   : > { %573 = shalt.err (!%p570_p3)
}
 0x15d   : > { %s574_s28 = scalar_lea.hbm %s1082_s23, 512  ;;  %s578_s3 = scalar_lea.hbm %s1125_s2, 1024 }
 0x15e   : > { %p575_p4 = scmp.ne.s32.totalorder %s1082_s23, %s574_s28  ;;  %p579_p9 = scmp.lt.s32.totalorder %s1082_s23, %s1125_s2 }
 0x15f   : > { %p580_p10 = scmp.lt.s32.totalorder %s578_s3, %s574_s28 }
 0x160   : > { %p576_p7 = pnand %p575_p4, %p678_p5 }
 0x161   : > { %p581_p11 = por %p580_p10, %p579_p9 }
 0x162   : > { %p577_p8 = pneg %p576_p7 }
 0x164   : > { %p582_p12 = pnand %p581_p11, %p577_p8 }
 0x166   : > { %585 = shalt.err (!%p582_p12)
}
 0x167   : > { %518 = dma.vmem_to_hbm [thread:$0]  (%p678_p5), %s1084_s17, 512, %s1082_s23, %s427_s13  }
 0x168 PF: > { %p524_p13 = scmp.ge.s32.totalorder %s620_s12, 2  ;;  %s453_s7 = sand.u32 1, %s608_s9  }
 0x169   : > { %s454_s5 = scalar_lea.sflag [#allocation3], %s453_s7 }
 0x16a   : > { %p521_p0 = pnand %p524_p13, %p682_p6 }
 0x16c   : > { %p522_p1 = pneg %p521_p0 }
 0x16e   : > { %603 = dma.done.wait (%p522_p1), %s454_s5, 512  }
 0x16f   : > { %605 = vsyncadd (%p522_p1), %s454_s5, 4294966784  ;;  %p12_p2 = scmp.ge.s32.totalorder %s665_s15, 4   ;;  %s1128_s9 = smov %s612_s10 }
 0x170   : > { %s1129_s10 = smov %s616_s11  ;;  %s1130_s11 = smov %s676_s18 }
 0x171   : > { %s1131_s12 = smov %s665_s15  ;;  %14 = sbr.rel (!%p12_p2) target bundleno = 3 (0x3), region = 63 }
 0x176   :  { %459 = vsyncpa [#allocation3], 1 }
 0x177   :  { %461 = vsyncpa [#allocation3 + $0x1], 1 }

</bundles_post_ra>
